<compile_context>
chip_gen: v5e
topology: v5e:2x2
jax: 0.10.0
libtpu: 0.0.40
codegen_flags: <defaults>
</compile_context>

<pallas_src>
import jax
import jax.numpy as jnp
from jax.experimental import pallas as pl
from jax.experimental.pallas import tpu as pltpu


def _moe_kernel(sched_ref, counts_ref, x_ref, g_ref, w1_ref, b1_ref, w2_ref,
                b2_ref, o_ref, acc_ref):
    """One (token-tile, scheduled-expert) step of the fused MoE."""
    i = pl.program_id(0)          # token tile
    e = pl.program_id(1)          # schedule slot (active experts first)

    @pl.when(e == 0)
    def _init():
        acc_ref[...] = jnp.zeros_like(acc_ref)

    # Compute only for the active experts of this tile; the remaining schedule
    # slots repeat the last active expert (no new weight DMA, no compute).
    @pl.when(e < counts_ref[i])
    def _compute():
        expert_id = sched_ref[i, e]                              # int32 scalar
        x = x_ref[...]                                           # (TN, dm) bf16
        h = jnp.dot(x, w1_ref[...], preferred_element_type=jnp.float32)
        h = jnp.maximum(h + b1_ref[...], 0.0)                    # (TN, dff) f32
        y = jnp.dot(h.astype(jnp.bfloat16), w2_ref[...],
                    preferred_element_type=jnp.float32)
        y = y + b2_ref[...]                                      # (TN, dout) f32

        # Select this expert's per-token combine weight from the resident gate
        # tile (cross-lane reduce on the XLU -> hidden under the MXU work).
        col = jax.lax.broadcasted_iota(jnp.int32, g_ref.shape, 1)
        gv = jnp.sum(jnp.where(col == expert_id, g_ref[...], 0.0),
                     axis=1, keepdims=True)                      # (TN, 1)

        acc_ref[...] += gv * y

    @pl.when(e == pl.num_programs(1) - 1)
    def _finalize():
        o_ref[...] = acc_ref[...].astype(o_ref.dtype)


def _round_up(a, m):
    return ((a + m - 1) // m) * m


def moe_forward(x, params, topk, *, token_tile=256):
    """x: (B, S, d_model) f32 -> (B, S, d_out) f32."""
    (ws1, bs1, ws2, bs2, wr1, br1, wr2, br2, wg, bg) = params
    B, S, d_model = x.shape
    num_shared = ws1.shape[0]
    num_routed = wr1.shape[0]
    d_ff = ws1.shape[-1]
    d_out = ws2.shape[-1]
    E_total = num_shared + num_routed

    N = B * S
    xf = x.reshape(N, d_model).astype(jnp.float32)

    # ---- gating (tiny matmul + softmax + top-k), plain-JAX glue in f32 ------
    logits = xf @ wg + bg                                     # (N, num_routed)
    weights = jax.nn.softmax(logits, axis=-1)
    topk_w, topk_i = jax.lax.top_k(weights, topk)             # (N, k)
    dense_g = jnp.sum(
        topk_w[..., None]
        * jax.nn.one_hot(topk_i, num_routed, dtype=jnp.float32),
        axis=-2)                                              # (N, num_routed)

    # Combine shared (constant weight 1/num_shared) + routed gates.
    g_all = jnp.concatenate(
        [jnp.full((N, num_shared), 1.0 / num_shared, jnp.float32), dense_g],
        axis=1)                                               # (N, E_total)

    # ---- pad to MXU/vreg-friendly shapes ------------------------------------
    TN = max(128, min(token_tile, _round_up(N, 128)))
    Npad = _round_up(N, TN)
    dmp = _round_up(d_model, 128)
    dfp = _round_up(d_ff, 128)
    dop = _round_up(d_out, 128)
    Egp = _round_up(E_total, 128)

    xf_p = jnp.pad(xf, ((0, Npad - N), (0, dmp - d_model))).astype(jnp.bfloat16)
    g_p = jnp.pad(g_all, ((0, Npad - N), (0, Egp - E_total)))  # f32

    # Stack shared + routed experts (weights bf16, biases f32).
    w1 = jnp.pad(jnp.concatenate([ws1, wr1], axis=0),
                 ((0, 0), (0, dmp - d_model), (0, dfp - d_ff))).astype(jnp.bfloat16)
    w2 = jnp.pad(jnp.concatenate([ws2, wr2], axis=0),
                 ((0, 0), (0, dfp - d_ff), (0, dop - d_out))).astype(jnp.bfloat16)
    b1 = jnp.pad(jnp.concatenate([bs1, br1], axis=0),
                 ((0, 0), (0, dfp - d_ff)))[:, None, :]        # (E, 1, dfp) f32
    b2 = jnp.pad(jnp.concatenate([bs2, br2], axis=0),
                 ((0, 0), (0, dop - d_out)))[:, None, :]       # (E, 1, dop) f32

    # ---- per-tile expert schedule (top-k sparsity: skip DMA + compute) ------
    n_tiles = Npad // TN
    act = (g_p[:, :E_total].reshape(n_tiles, TN, E_total) > 0.0).any(axis=1)
    counts = jnp.sum(act, axis=1).astype(jnp.int32)            # (n_tiles,)
    order = jnp.argsort(jnp.logical_not(act), axis=1,
                        stable=True).astype(jnp.int32)         # active first
    last = jnp.take_along_axis(
        order, jnp.clip(counts - 1, 0, E_total - 1)[:, None], axis=1)
    pos = jnp.arange(E_total, dtype=jnp.int32)[None, :]
    sched = jnp.where(pos < counts[:, None], order, last).astype(jnp.int32)

    flops = 2 * Npad * E_total * (dmp * dfp + dfp * dop)
    bytes_accessed = (xf_p.size * 2 + g_p.size * 4
                      + n_tiles * (w1.size * 2 + w2.size * 2
                                   + b1.size * 4 + b2.size * 4)
                      + Npad * dop * 4)

    out = pl.pallas_call(
        _moe_kernel,
        out_shape=jax.ShapeDtypeStruct((Npad, dop), jnp.float32),
        grid_spec=pltpu.PrefetchScalarGridSpec(
            num_scalar_prefetch=2,
            grid=(n_tiles, E_total),
            in_specs=[
                pl.BlockSpec((TN, dmp), lambda i, e, s, c: (i, 0)),       # x
                pl.BlockSpec((TN, Egp), lambda i, e, s, c: (i, 0)),       # gates
                pl.BlockSpec((None, dmp, dfp),
                             lambda i, e, s, c: (s[i, e], 0, 0)),         # W1
                pl.BlockSpec((None, 1, dfp),
                             lambda i, e, s, c: (s[i, e], 0, 0)),         # b1
                pl.BlockSpec((None, dfp, dop),
                             lambda i, e, s, c: (s[i, e], 0, 0)),         # W2
                pl.BlockSpec((None, 1, dop),
                             lambda i, e, s, c: (s[i, e], 0, 0)),         # b2
            ],
            out_specs=pl.BlockSpec((TN, dop), lambda i, e, s, c: (i, 0)),
            scratch_shapes=[pltpu.VMEM((TN, dop), jnp.float32)],
        ),
        compiler_params=pltpu.CompilerParams(
            dimension_semantics=("parallel", "arbitrary")),
        cost_estimate=pl.CostEstimate(
            flops=flops, transcendentals=0, bytes_accessed=bytes_accessed),
    )(sched, counts, xf_p, g_p, w1, b1, w2, b2)

    return out[:N, :d_out].reshape(B, S, d_out)


def _reference_forward(x, params, topk):
    """Pure-JAX f32 reference matching the PyTorch forward (eval mode)."""
    (ws1, bs1, ws2, bs2, wr1, br1, wr2, br2, wg, bg) = params
    num_shared = ws1.shape[0]
    num_routed = wr1.shape[0]

    def expert(xx, w1, b1, w2, b2):
        return jnp.maximum(xx @ w1 + b1, 0.0) @ w2 + b2

    shared = sum(expert(x, ws1[s], bs1[s], ws2[s], bs2[s])
                 for s in range(num_shared)) / num_shared

    logits = x @ wg + bg
    weights = jax.nn.softmax(logits, axis=-1)
    topk_w, topk_i = jax.lax.top_k(weights, topk)
    one_hot = jax.nn.one_hot(topk_i, num_routed, dtype=x.dtype)  # (B,S,k,E)
    expert_outs = jnp.stack(
        [expert(x, wr1[e], br1[e], wr2[e], br2[e]) for e in range(num_routed)],
        axis=-2)                                                 # (B,S,E,d_out)
    routed = jnp.einsum("bske,bsed->bskd", one_hot, expert_outs)
    routed = jnp.sum(topk_w[..., None] * routed, axis=2)
    return shared + routed


def init_params(key, d_model, d_ff, d_out, num_shared, num_routed):
    ks = jax.random.split(key, 10)
    scale = 0.05
    ws1 = scale * jax.random.normal(ks[0], (num_shared, d_model, d_ff), jnp.float32)
    bs1 = scale * jax.random.normal(ks[1], (num_shared, d_ff), jnp.float32)
    ws2 = scale * jax.random.normal(ks[2], (num_shared, d_ff, d_out), jnp.float32)
    bs2 = scale * jax.random.normal(ks[3], (num_shared, d_out), jnp.float32)
    wr1 = scale * jax.random.normal(ks[4], (num_routed, d_model, d_ff), jnp.float32)
    br1 = scale * jax.random.normal(ks[5], (num_routed, d_ff), jnp.float32)
    wr2 = scale * jax.random.normal(ks[6], (num_routed, d_ff, d_out), jnp.float32)
    br2 = scale * jax.random.normal(ks[7], (num_routed, d_out), jnp.float32)
    wg = scale * jax.random.normal(ks[8], (d_model, num_routed), jnp.float32)
    bg = scale * jax.random.normal(ks[9], (num_routed,), jnp.float32)
    return (ws1, bs1, ws2, bs2, wr1, br1, wr2, br2, wg, bg)


if __name__ == "__main__":
    B, S = 2, 8
    d_model, d_ff, d_out = 32, 64, 32
    num_shared, num_routed, topk = 2, 4, 2

    key = jax.random.PRNGKey(0)
    kx, kp = jax.random.split(key)
    x = jax.random.normal(kx, (B, S, d_model), jnp.float32)
    params = init_params(kp, d_model, d_ff, d_out, num_shared, num_routed)

    out = moe_forward(x, params, topk)
    out = jax.block_until_ready(out)

    ref = _reference_forward(x, params, topk)
    assert out.shape == (B, S, d_out)
    # bf16 activations/weights with f32 accumulation -> loosened tolerance.
    assert jnp.allclose(out, ref, atol=3e-2, rtol=3e-2), "mismatch vs reference"

    print("KERNEL_OK")
</pallas_src>

<mosaic_0001>
module attributes {stable_mosaic.version = 11 : i64} {
  func.func @_moe_kernel(%arg0: i32, %arg1: i32, %arg2: memref<1x6xi32, #tpu.memory_space<smem>>, %arg3: memref<1xi32, #tpu.memory_space<smem>>, %arg4: memref<128x128xbf16, #tpu.memory_space<vmem>>, %arg5: memref<128x128xf32, #tpu.memory_space<vmem>>, %arg6: memref<1x128x128xbf16, #tpu.memory_space<vmem>>, %arg7: memref<1x1x128xf32, #tpu.memory_space<vmem>>, %arg8: memref<1x128x128xbf16, #tpu.memory_space<vmem>>, %arg9: memref<1x1x128xf32, #tpu.memory_space<vmem>>, %arg10: memref<128x128xf32, #tpu.memory_space<vmem>>, %arg11: memref<128x128xf32, #tpu.memory_space<vmem>>) attributes {dimension_semantics = [#tpu.dimension_semantics<parallel>, #tpu.dimension_semantics<arbitrary>], iteration_bounds = array<i64: 1, 6>, scalar_prefetch = 2 : i64, scratch_operands = 1 : i64, tpu.core_type = #tpu.core_type<tc>, window_params = [{transform_indices = @transform_0, window_bounds = array<i64: 128, 128>}, {transform_indices = @transform_1, window_bounds = array<i64: 128, 128>}, {transform_indices = @transform_2, window_bounds = array<i64: 1, 128, 128>}, {transform_indices = @transform_3, window_bounds = array<i64: 1, 1, 128>}, {transform_indices = @transform_4, window_bounds = array<i64: 1, 128, 128>}, {transform_indices = @transform_5, window_bounds = array<i64: 1, 1, 128>}, {transform_indices = @transform_6, window_bounds = array<i64: 128, 128>}]} {
    %c0_i32 = arith.constant 0 : i32
    %0 = arith.cmpi eq, %arg1, %c0_i32 : i32
    %1 = arith.extui %0 : i1 to i32
    %c0_i32_0 = arith.constant 0 : i32
    %2 = arith.cmpi ne, %1, %c0_i32_0 : i32
    scf.if %2 {
      %cst = arith.constant 0.000000e+00 : f32
      %11 = vector.broadcast %cst : f32 to vector<128x128xf32>
      %c0 = arith.constant 0 : index
      %c0_3 = arith.constant 0 : index
      %12 = vector.load %arg11[%c0, %c0_3] : memref<128x128xf32, #tpu.memory_space<vmem>>, vector<128x128xf32>
      tpu.vector_store %arg11[%c0, %c0_3], %11 {strides = array<i32>} : memref<128x128xf32, #tpu.memory_space<vmem>>, vector<128x128xf32>,
    } else {
    }
    %3 = arith.index_cast %arg0 : i32 to index
    %4 = memref.load %arg3[%3] : memref<1xi32, #tpu.memory_space<smem>>
    %5 = arith.cmpi slt, %arg1, %4 : i32
    %6 = arith.extui %5 : i1 to i32
    %c0_i32_1 = arith.constant 0 : i32
    %7 = arith.cmpi ne, %6, %c0_i32_1 : i32
    scf.if %7 {
      %11 = arith.index_cast %arg0 : i32 to index
      %12 = arith.index_cast %arg1 : i32 to index
      %13 = memref.load %arg2[%11, %12] : memref<1x6xi32, #tpu.memory_space<smem>>
      %c0 = arith.constant 0 : index
      %c0_3 = arith.constant 0 : index
      %14 = vector.load %arg4[%c0, %c0_3] : memref<128x128xbf16, #tpu.memory_space<vmem>>, vector<128x128xbf16>
      %c0_4 = arith.constant 0 : index
      %c0_5 = arith.constant 0 : index
      %c0_6 = arith.constant 0 : index
      %15 = vector.load %arg6[%c0_4, %c0_5, %c0_6] : memref<1x128x128xbf16, #tpu.memory_space<vmem>>, vector<1x128x128xbf16>
      %16 = vector.shape_cast %15 : vector<1x128x128xbf16> to vector<128x128xbf16>
      %cst = arith.constant dense<0.000000e+00> : vector<128x128xf32>
      %17 = tpu.matmul %14, %16, %cst {dimension_numbers = #tpu.dot_dimension_numbers<[1], [0], [0], [1], [0, 0, 1, 1], [], []>} : vector<128x128xbf16>, vector<128x128xbf16>, vector<128x128xf32> -> vector<128x128xf32>
      %c0_7 = arith.constant 0 : index
      %c0_8 = arith.constant 0 : index
      %c0_9 = arith.constant 0 : index
      %18 = vector.load %arg7[%c0_7, %c0_8, %c0_9] : memref<1x1x128xf32, #tpu.memory_space<vmem>>, vector<1x1x128xf32>
      %19 = vector.shape_cast %18 : vector<1x1x128xf32> to vector<1x128xf32>
      %20 = vector.broadcast %19 : vector<1x128xf32> to vector<128x128xf32>
      %21 = arith.addf %17, %20 : vector<128x128xf32>
      %cst_10 = arith.constant 0.000000e+00 : f32
      %22 = vector.broadcast %cst_10 : f32 to vector<128x128xf32>
      %23 = arith.maximumf %21, %22 : vector<128x128xf32>
      %24 = arith.truncf %23 : vector<128x128xf32> to vector<128x128xbf16>
      %c0_11 = arith.constant 0 : index
      %c0_12 = arith.constant 0 : index
      %c0_13 = arith.constant 0 : index
      %25 = vector.load %arg8[%c0_11, %c0_12, %c0_13] : memref<1x128x128xbf16, #tpu.memory_space<vmem>>, vector<1x128x128xbf16>
      %26 = vector.shape_cast %25 : vector<1x128x128xbf16> to vector<128x128xbf16>
      %cst_14 = arith.constant dense<0.000000e+00> : vector<128x128xf32>
      %27 = tpu.matmul %24, %26, %cst_14 {dimension_numbers = #tpu.dot_dimension_numbers<[1], [0], [0], [1], [0, 0, 1, 1], [], []>} : vector<128x128xbf16>, vector<128x128xbf16>, vector<128x128xf32> -> vector<128x128xf32>
      %c0_15 = arith.constant 0 : index
      %c0_16 = arith.constant 0 : index
      %c0_17 = arith.constant 0 : index
      %28 = vector.load %arg9[%c0_15, %c0_16, %c0_17] : memref<1x1x128xf32, #tpu.memory_space<vmem>>, vector<1x1x128xf32>
      %29 = vector.shape_cast %28 : vector<1x1x128xf32> to vector<1x128xf32>
      %30 = vector.broadcast %29 : vector<1x128xf32> to vector<128x128xf32>
      %31 = arith.addf %27, %30 : vector<128x128xf32>
      %32 = tpu.iota {dimensions = array<i32: 1>} : vector<128x128xi32>
      %33 = vector.broadcast %13 : i32 to vector<128x128xi32>
      %34 = arith.cmpi eq, %32, %33 : vector<128x128xi32>
      %c0_18 = arith.constant 0 : index
      %c0_19 = arith.constant 0 : index
      %35 = vector.load %arg5[%c0_18, %c0_19] : memref<128x128xf32, #tpu.memory_space<vmem>>, vector<128x128xf32>
      %cst_20 = arith.constant 0.000000e+00 : f32
      %36 = vector.broadcast %cst_20 : f32 to vector<128x128xf32>
      %37 = arith.select %34, %35, %36 : vector<128x128xi1>, vector<128x128xf32>
      %cst_21 = arith.constant dense<0.000000e+00> : vector<128xf32>
      %38 = vector.multi_reduction <add>, %37, %cst_21 [1] : vector<128x128xf32> to vector<128xf32>
      %39 = vector.shape_cast %38 : vector<128xf32> to vector<128x1xf32>
      %c0_22 = arith.constant 0 : index
      %c0_23 = arith.constant 0 : index
      %40 = vector.load %arg11[%c0_22, %c0_23] : memref<128x128xf32, #tpu.memory_space<vmem>>, vector<128x128xf32>
      %41 = vector.broadcast %39 : vector<128x1xf32> to vector<128x128xf32>
      %42 = arith.mulf %41, %31 : vector<128x128xf32>
      %43 = arith.addf %40, %42 : vector<128x128xf32>
      %c0_24 = arith.constant 0 : index
      %c0_25 = arith.constant 0 : index
      %44 = vector.load %arg11[%c0_24, %c0_25] : memref<128x128xf32, #tpu.memory_space<vmem>>, vector<128x128xf32>
      tpu.vector_store %arg11[%c0_24, %c0_25], %43 {strides = array<i32>} : memref<128x128xf32, #tpu.memory_space<vmem>>, vector<128x128xf32>,
    } else {
    }
    %c5_i32 = arith.constant 5 : i32
    %8 = arith.cmpi eq, %arg1, %c5_i32 : i32
    %9 = arith.extui %8 : i1 to i32
    %c0_i32_2 = arith.constant 0 : i32
    %10 = arith.cmpi ne, %9, %c0_i32_2 : i32
    scf.if %10 {
      %c0 = arith.constant 0 : index
      %c0_3 = arith.constant 0 : index
      %11 = vector.load %arg11[%c0, %c0_3] : memref<128x128xf32, #tpu.memory_space<vmem>>, vector<128x128xf32>
      %c0_4 = arith.constant 0 : index
      %c0_5 = arith.constant 0 : index
      %12 = vector.load %arg10[%c0_4, %c0_5] : memref<128x128xf32, #tpu.memory_space<vmem>>, vector<128x128xf32>
      tpu.vector_store %arg10[%c0_4, %c0_5], %11 {strides = array<i32>} : memref<128x128xf32, #tpu.memory_space<vmem>>, vector<128x128xf32>,
    } else {
    }
    return
  }
  func.func @transform_0(%arg0: i32, %arg1: i32, %arg2: memref<1x6xi32, #tpu.memory_space<smem>>, %arg3: memref<1xi32, #tpu.memory_space<smem>>) -> (i32, i32) {
    %c0_i32 = arith.constant 0 : i32
    %c0_i32_0 = arith.constant 0 : i32
    return %arg0, %c0_i32 : i32, i32
  }
  func.func @transform_1(%arg0: i32, %arg1: i32, %arg2: memref<1x6xi32, #tpu.memory_space<smem>>, %arg3: memref<1xi32, #tpu.memory_space<smem>>) -> (i32, i32) {
    %c0_i32 = arith.constant 0 : i32
    %c0_i32_0 = arith.constant 0 : i32
    return %arg0, %c0_i32 : i32, i32
  }
  func.func @transform_2(%arg0: i32, %arg1: i32, %arg2: memref<1x6xi32, #tpu.memory_space<smem>>, %arg3: memref<1xi32, #tpu.memory_space<smem>>) -> (i32, i32, i32) {
    %0 = arith.index_cast %arg0 : i32 to index
    %1 = arith.index_cast %arg1 : i32 to index
    %2 = memref.load %arg2[%0, %1] : memref<1x6xi32, #tpu.memory_space<smem>>
    %c0_i32 = arith.constant 0 : i32
    %c0_i32_0 = arith.constant 0 : i32
    %c0_i32_1 = arith.constant 0 : i32
    return %2, %c0_i32, %c0_i32_0 : i32, i32, i32
  }
  func.func @transform_3(%arg0: i32, %arg1: i32, %arg2: memref<1x6xi32, #tpu.memory_space<smem>>, %arg3: memref<1xi32, #tpu.memory_space<smem>>) -> (i32, i32, i32) {
    %0 = arith.index_cast %arg0 : i32 to index
    %1 = arith.index_cast %arg1 : i32 to index
    %2 = memref.load %arg2[%0, %1] : memref<1x6xi32, #tpu.memory_space<smem>>
    %c0_i32 = arith.constant 0 : i32
    %c0_i32_0 = arith.constant 0 : i32
    %c0_i32_1 = arith.constant 0 : i32
    return %2, %c0_i32, %c0_i32_0 : i32, i32, i32
  }
  func.func @transform_4(%arg0: i32, %arg1: i32, %arg2: memref<1x6xi32, #tpu.memory_space<smem>>, %arg3: memref<1xi32, #tpu.memory_space<smem>>) -> (i32, i32, i32) {
    %0 = arith.index_cast %arg0 : i32 to index
    %1 = arith.index_cast %arg1 : i32 to index
    %2 = memref.load %arg2[%0, %1] : memref<1x6xi32, #tpu.memory_space<smem>>
    %c0_i32 = arith.constant 0 : i32
    %c0_i32_0 = arith.constant 0 : i32
    %c0_i32_1 = arith.constant 0 : i32
    return %2, %c0_i32, %c0_i32_0 : i32, i32, i32
  }
  func.func @transform_5(%arg0: i32, %arg1: i32, %arg2: memref<1x6xi32, #tpu.memory_space<smem>>, %arg3: memref<1xi32, #tpu.memory_space<smem>>) -> (i32, i32, i32) {
    %0 = arith.index_cast %arg0 : i32 to index
    %1 = arith.index_cast %arg1 : i32 to index
    %2 = memref.load %arg2[%0, %1] : memref<1x6xi32, #tpu.memory_space<smem>>
    %c0_i32 = arith.constant 0 : i32
    %c0_i32_0 = arith.constant 0 : i32
    %c0_i32_1 = arith.constant 0 : i32
    return %2, %c0_i32, %c0_i32_0 : i32, i32, i32
  }
  func.func @transform_6(%arg0: i32, %arg1: i32, %arg2: memref<1x6xi32, #tpu.memory_space<smem>>, %arg3: memref<1xi32, #tpu.memory_space<smem>>) -> (i32, i32) {
    %c0_i32 = arith.constant 0 : i32
    %c0_i32_0 = arith.constant 0 : i32
    return %arg0, %c0_i32 : i32, i32
  }
}

</mosaic_0001>

<bundles_post_ra>
// kernel: tpu_custom_call.1
= control target key start
LH: loop header
LB: loop body
LE: loop exit
PB: predicated region body
PF: predicated region fallthrough
CT: control target
= control target key end

     0   :  { %s1890_s10 = smov [#allocation4]   ;;  %s2422_s0 = inlined_call_operand.vmem [shape: s32[1,6], index: 0, kind: input, shape index: {}]   ;;  %s2423_s1 = inlined_call_operand.<no memory space> [shape: s32[1], index: 1, kind: input, shape index: {}]   ;;  %s2424_s2 = inlined_call_operand.hbm [shape: bf16[128,128], index: 2, kind: input, shape index: {}]   ;;  %s2425_s3 = inlined_call_operand.hbm [shape: f32[128,128], index: 3, kind: input, shape index: {}]   ;;  %s2426_s4 = inlined_call_operand.hbm [shape: bf16[6,128,128], index: 4, kind: input, shape index: {}]   ;;  %s2427_s5 = inlined_call_operand.hbm [shape: f32[6,1,128], index: 5, kind: input, shape index: {}]   ;;  %s2428_s6 = inlined_call_operand.hbm [shape: bf16[6,128,128], index: 6, kind: input, shape index: {}]   ;;  %s2429_s7 = inlined_call_operand.vmem [shape: f32[6,1,128], index: 7, kind: input, shape index: {}]   ;;  %s2430_s8 = inlined_call_operand.hbm [shape: f32[128,128], index: 8, kind: output, shape index: {}]  }
   0x1   :  { %2451 = sst [smem:[#allocation41_spill]] %s2424_s2  ;;  %s14_s29 = sshll.u32 %s2422_s0, 4  ;;  %s15_s29 = int_to_ptr.vmem [resolvable:$true] %s14_s29 }
   0x2   :  { %2452 = sst [smem:[#allocation42_spill]] %s2426_s4 }
   0x3   :  { %2453 = sst [smem:[#allocation43_spill]] %s2429_s7 }
   0x4   :  { %2454 = sst [smem:[#allocation44_spill]] %s2430_s8 }
   0x5   :  { %18 = sst [smem:[#allocation5]] %s2423_s1 }
   0x6   :  { %17 = dma.vmem_to_smem %s15_s29, 16, %s1890_s10, [#allocation3] }
   0x7   :  { %1816 = dma.done.wait [#allocation3], 16 }
   0x8   :  { %1817 = vsyncadd [#allocation3], 4294967280 }
   0x9   :  { %21 = sfence }
   0xa   :  { %22 = vsyncpa [#allocation7], 0 }
   0xb   :  { %23 = vsyncpa [#allocation10], 0 }
   0xc   :  { %24 = vsyncpa [#allocation8], 0  ;;  %s1952_s11 = smov 0   ;;  %s1954_s12 = smov 0  }
   0xd   :  { %s1956_s13 = smov 0   ;;  %s1958_s0 = smov 0  }
   0xe   :  { %s1960_s14 = smov 0   ;;  %s1962_s1 = smov 0  }
   0xf   :  { %s1964_s15 = smov 0   ;;  %s1966_s16 = smov 0  }
  0x10   :  { %s1968_s17 = smov 0   ;;  %s1970_s18 = smov 0  }
  0x11   :  { %s1972_s19 = smov 0   ;;  %s1974_s20 = smov 0  }
  0x12 LB: > { %2455 = sst [smem:[#allocation28_spill]] %s1860_s14  ;;  %s2013_s21 = sadd.s32 4294967295, %s1888_s20   ;;  %s1888_s20 = sphi %s1974_s20, %s30_s20   ;;  %s1884_s19 = sphi %s1972_s19, %s2518_s19   ;;  %s1880_s18 = sphi %s1970_s18, %s2522_s18   ;;  %s1876_s17 = sphi %s1968_s17, %s2516_s17   ;;  %s1872_s16 = sphi %s1966_s16, %s2515_s16   ;;  %s1868_s15 = sphi %s1964_s15, %s2514_s15   ;;  %s1864_s1 = sphi %s1962_s1, %s2513_s1   ;;  %s1860_s14 = sphi %s1960_s14, %s2512_s14   ;;  %s1856_s0 = sphi %s1958_s0, %s2511_s0   ;;  %s1852_s13 = sphi %s1956_s13, %s2521_s13   ;;  %s1848_s12 = sphi %s1954_s12, %s2520_s12   ;;  %s1844_s11 = sphi %s1952_s11, %s2519_s11  }
  0x13   : > { %2456 = sst [smem:[#allocation29_spill]] %s1864_s1  ;;  %p1250_p0 = scmp.ge.s32.totalorder %s1888_s20, 1 }
  0x14   : > { %2457 = sst [smem:[#allocation30_spill]] %s1872_s16  ;;  %p2445_p1 = scmp.eq.s32.totalorder %s2013_s21, 0 }
  0x15   : > { %2458 = sst [smem:[#allocation31_spill]] %s1876_s17  ;;  %p293_p2 = scmp.lt.s32.totalorder %s1888_s20, 7 }
  0x16   : > { %2459 = sst [smem:[#allocation32_spill]] %s1880_s18  ;;  %s1891_s26 = smov [#allocation6]  }
  0x17   : > { %2460 = sst [smem:[#allocation33_spill]] %s1884_s19  ;;  %p2021_p3 = pnand %p1250_p0, %p293_p2 }
  0x18   : > { %s2461_s2 = sld [smem:[#allocation41_spill]]  ;;  %s309_s27 = sshll.u32 %s1891_s26, 4  ;;  %s310_s27 = int_to_ptr.vmem [resolvable:$true] %s309_s27 }
  0x19   : > { %s2462_s25 = scalar_select %p2021_p3, 1, 0 }
  0x1a   : > { %p1439_p4 = pneg %p2021_p3  ;;  %p2447_p6 = scmp.lt.s32.totalorder %s1888_s20, 6 }
  0x1b   : > { %2463 = sst [smem:[#allocation34_spill]] %s2462_s25  ;;  %s2431_s29 = smov 64  }
  0x1c   : > { %p2029_p5 = pnand %p1439_p4, %p2445_p1  ;;  %s2433_s30 = smov 4  }
  0x1d   : > { %s39_s9 = sadd.s32 1, %s1884_s19  ;;  %s98_s10 = sshra.s32 %s1884_s19, 7 }
  0x1e   : > { %s307_s24 = sshll.u32 %s2461_s2, 4  ;;  %p40_p7 = scmp.ge.s32.totalorder %s39_s9, 6  ;;  %s308_s24 = int_to_ptr.hbm [resolvable:$true] %s307_s24 }
  0x1f   : > { %1442 = dma.hbm_to_vmem [thread:$0]  (!%p2029_p5), %s308_s24, 1024, %s310_s27, [#allocation7], %s2431_s29, %s2431_s29, %s2433_s30  }
  0x20   : > { %s1242_s22 = sshll.u32 %s98_s10, 7  ;;  %s103_s23 = sand.u32 127, %s1884_s19 }
  0x21   : > { %s117_s26 = sadd.s32 1, %s1876_s17  ;;  %s2524_s9 = smov (%p40_p7, %s39_s9), 0 }
  0x22   : > { %2465 = sst [smem:[#allocation35_spill]] %s2524_s9  ;;  %s2045_s2 = sadd.s32 %s1242_s22, %s103_s23 }
  0x23   : > { %p124_p8 = scmp.ne.s32.totalorder %s1876_s17, %s1872_s16  ;;  %s105_s24 = sld [smem:[#allocation4 + %s2045_s2]] }
  0x24   : > { %s106_s27 = sshra.s32 %s2524_s9, 7  ;;  %s111_s30 = sand.u32 127, %s2524_s9 }
  0x25   : > { %s1243_s29 = sshll.u32 %s106_s27, 7  ;;  %p2446_p9 = scmp.eq.s32.totalorder %s1888_s20, 0 }
  0x26   : > { %s2052_s8 = sadd.s32 %s1243_s29, %s111_s30  ;;  %p130_p10 = scmp.ne.s32.totalorder %s1872_s16, %s1868_s15 }
  0x27   : > { %s113_s10 = sld [smem:[#allocation4 + %s2052_s8]]  ;;  %p2060_p11 = por %p2446_p9, %p124_p8 }
  0x28   : > { %p2067_p12 = por %p2445_p1, %p130_p10  ;;  %s342_s30 = sand.u32 1, %s1876_s17  }
  0x29   : > { %p2076_p13 = pnand %p2447_p6, %p2060_p11  ;;  %s1254_s27 = sshll.u32 %s342_s30, 6 }
  0x2a   : > { %s2467_s29 = scalar_select %p2067_p12, 1, 0 }
  0x2b   : > { %s344_s9 = scalar_lea.vmem [#allocation11], %s1254_s27  ;;  %s2100_s30 = sld [smem:[#allocation4 + %s2052_s8]] }
  0x2c   : > { %2468 = sst [smem:[#allocation36_spill]] %s2467_s29  ;;  %s2080_s19 = sshll.u32 %s344_s9, 4 }
  0x2d   : > { %s114_s23 = ssub.s32 %s105_s24, %s113_s10  ;;  %2470 = sst [smem:[#allocation37_spill]] %s2080_s19 }
  0x2e   : > { %p115_p0 = scmp.eq.s32.totalorder %s114_s23, 0  ;;  %s2096_s10 = sld [smem:[#allocation4 + %s2045_s2]] }
  0x2f   : > { %s1419_s7 = scalar_select %p2060_p11, [#allocation4], [#allocation15] }
  0x30   : > { %s2086_s18 = scalar_select %p115_p0, %s1876_s17, %s117_s26  }
  0x31   : > { %s1420_s29 = scalar_select %p2060_p11, %s2045_s2, 0 }
  0x32   : > { %2471 = sst [smem:[#allocation38_spill]] %s2086_s18  ;;  %s2526_s7 = smov (!%p2447_p6, %s1419_s7), [#allocation18] }
  0x33   : > { %s2528_s29 = smov (!%p2447_p6, %s1420_s29), 0  ;;  %p166_p2 = scmp.ne.s32.totalorder %s1864_s1, %s1860_s14 }
  0x34   : > { %s352_s24 = sld [smem:[%s2526_s7 + %s2528_s29]]  ;;  %p172_p4 = scmp.ne.s32.totalorder %s1860_s14, %s1856_s0 }
  0x35   : > { %s372_s23 = sand.u32 1, %s1864_s1   ;;  %p2109_p7 = por %p166_p2, %p2446_p9 }
  0x36   : > { %p2115_p8 = por %p172_p4, %p2445_p1  ;;  %s2475_s4 = sld [smem:[#allocation42_spill]] }
  0x37   : > { %s373_s19 = scalar_lea.vmem [#allocation12], %s372_s23  ;;  %s156_s17 = ssub.s32 %s2096_s10, %s2100_s30 }
  0x38   : > { %s2473_s7 = scalar_select %p2115_p8, 1, 0 }
  0x39   : > { %s388_s18 = sshll.u32 %s373_s19, 4  ;;  %s2476_s14 = sand.u32 1, %s1888_s20   ;;  %s2122_s18 = int_to_ptr.vmem [resolvable:$true] %s388_s18 }
  0x3a   : > { %s1373_s22 = sshll.u32 %s352_s24, 6  ;;  %2474 = sst [smem:[#allocation39_spill]] %s2473_s7 }
  0x3b   : > { %s2128_s16 = scalar_lea.sflag [#allocation7], %s2476_s14  ;;  %p1624_p11 = pneg %p2076_p13 }
  0x3c   : > { %s357_s9 = scalar_lea.hbm %s2475_s4, %s1373_s22  ;;  %s1627_s19 = scalar_lea.hbm %s2475_s4, 384 }
  0x3d   : > { %s358_s0 = sshll.u32 %s357_s9, 4  ;;  %s359_s0 = int_to_ptr.hbm [resolvable:$true] %s358_s0 }
  0x3e   : > { %s1620_s24 = sshra.s32 %s359_s0, 4  ;;  %s1621_s24 = int_to_ptr.hbm [resolvable:$true] %s1620_s24 }
  0x3f   : > { %s1622_s25 = scalar_lea.hbm %s1621_s24, 64  ;;  %p1628_p4 = scmp.lt.s32.totalorder %s1621_s24, %s2475_s4 }
  0x40   : > { %p1623_p10 = scmp.ne.s32.totalorder %s1621_s24, %s1622_s25  ;;  %p1629_p1 = scmp.lt.s32.totalorder %s1627_s19, %s1622_s25 }
  0x42   : > { %p1625_p0 = pnand %p1624_p11, %p1623_p10  ;;  %p1630_p9 = por %p1629_p1, %p1628_p4 }
  0x44   : > { %p1626_p2 = pneg %p1625_p0 }
  0x46   : > { %p1631_p6 = pnand %p1630_p9, %p1626_p2 }
  0x48   : > { %1634 = shalt.err (!%p1631_p6)
}
  0x49   : > { %s2477_s14 = smov 4   ;;  %s2478_s10 = smov 64  }
  0x4a   : > { %s2479_s30 = sld [smem:[#allocation37_spill]]  ;;  %p157_p1 = scmp.eq.s32.totalorder %s156_s17, 0 }
  0x4b   : > { %p2481_p6 = scmp.lt.s32.totalorder %s1888_s20, 6  ;;  %s2483_s24 = sadd.s32 1, %s1864_s1 }
  0x4c   : > { %s1422_s15 = scalar_select %p2109_p7, [#allocation4], [#allocation16] }
  0x4d   : > { %p2150_p9 = pnand %p2481_p6, %p2109_p7  ;;  %p2485_p10 = pmov %p2481_p6 }
  0x4e   : > { %s2159_s29 = scalar_select %p157_p1, %s1864_s1, %s2483_s24  }
  0x4f   : > { %s1423_s22 = scalar_select %p2109_p7, %s2045_s2, 0 }
  0x50   : > { %s2480_s27 = int_to_ptr.vmem [resolvable:$true] %s2479_s30  ;;  %2484 = sst [smem:[#allocation40_spill]] %s2159_s29 }
  0x51   : > { %1451 = dma.hbm_to_vmem [thread:$0]  (!%p2076_p13), %s359_s0, 1024, %s2480_s27, %s2128_s16, %s2478_s10, %s2478_s10, %s2477_s14  }
  0x52   : > { %s2530_s15 = smov (!%p2485_p10, %s1422_s15), [#allocation19]  ;;  %p2486_p11 = pmov %p2481_p6 }
  0x53   : > { %s324_s17 = sshll.u32 %s2425_s3, 4  ;;  %s1894_s23 = smov [#allocation9]   ;;  %s325_s17 = int_to_ptr.hbm [resolvable:$true] %s324_s17 }
  0x54   : > { %s2532_s22 = smov (!%p2486_p11, %s1423_s22), 0  ;;  %s326_s30 = sshll.u32 %s1894_s23, 4  ;;  %s327_s30 = int_to_ptr.vmem [resolvable:$true] %s326_s30 }
  0x55   : > { %s381_s9 = sld [smem:[%s2530_s15 + %s2532_s22]]  ;;  %s1895_s27 = smov 128  }
  0x56   : > { %s1896_s4 = smov 8   ;;  %p1684_p7 = pneg %p2150_p9 }
  0x57   : > { %1445 = dma.hbm_to_vmem [thread:$0]  (!%p2029_p5), %s325_s17, 2048, %s327_s30, [#allocation10], %s1895_s27, %s1895_s27, %s1896_s4  }
  0x58   : > { %s1687_s19 = scalar_lea.hbm %s2427_s5, 6 }
  0x5b   : > { %s384_s29 = scalar_lea.hbm %s2427_s5, %s381_s9 }
  0x5c   : > { %s386_s1 = sshll.u32 %s384_s29, 4  ;;  %s387_s1 = int_to_ptr.hbm [resolvable:$true] %s386_s1 }
  0x5d   : > { %s1680_s7 = sshra.s32 %s387_s1, 4  ;;  %s1681_s7 = int_to_ptr.hbm [resolvable:$true] %s1680_s7 }
  0x5e   : > { %s1682_s0 = scalar_lea.hbm %s1681_s7, 1  ;;  %p1688_p5 = scmp.lt.s32.totalorder %s1681_s7, %s2427_s5 }
  0x5f   : > { %p1683_p13 = scmp.ne.s32.totalorder %s1681_s7, %s1682_s0  ;;  %p1689_p4 = scmp.lt.s32.totalorder %s1687_s19, %s1682_s0 }
  0x61   : > { %p1685_p0 = pnand %p1684_p7, %p1683_p13  ;;  %p1690_p1 = por %p1689_p4, %p1688_p5 }
  0x63   : > { %p1686_p2 = pneg %p1685_p0 }
  0x65   : > { %p1691_p6 = pnand %p1690_p1, %p1686_p2 }
  0x67   : > { %1694 = shalt.err (!%p1691_p6)
}
  0x68   : > { %1456 = dma.hbm_to_vmem [thread:$0]  (!%p2150_p9), %s387_s1, 16, %s2122_s18, %s2128_s16  }
  0x69   : > { %s189_s7 = sld [smem:[#allocation4 + %s2045_s2]]  ;;  %p208_p10 = scmp.ne.s32.totalorder %s1852_s13, %s1848_s12 }
  0x6a   : > { %s197_s25 = sld [smem:[#allocation4 + %s2052_s8]]  ;;  %p214_p11 = scmp.ne.s32.totalorder %s1848_s12, %s1844_s11 }
  0x6b   : > { %p2487_p13 = scmp.eq.s32.totalorder %s1888_s20, 0  ;;  %p2488_p0 = scmp.eq.s32.totalorder %s2013_s21, 0 }
  0x6c   : > { %s397_s17 = sand.u32 1, %s1852_s13   ;;  %s201_s30 = sadd.s32 1, %s1852_s13 }
  0x6d   : > { %p210_p7 = por %p208_p10, %p2487_p13  ;;  %p2198_p2 = por %p214_p11, %p2488_p0 }
  0x6e   : > { %s1259_s1 = sshll.u32 %s397_s17, 6  ;;  %p2490_p9 = scmp.lt.s32.totalorder %s1888_s20, 6 }
  0x6f   : > { %s1425_s9 = scalar_select %p210_p7, [#allocation4], [#allocation17] }
  0x70   : > { %s2534_s2 = smov (!%p210_p7, %s2045_s2), 0  ;;  %s198_s23 = ssub.s32 %s189_s7, %s197_s25 }
  0x71   : > { %p199_p5 = scmp.eq.s32.totalorder %s198_s23, 0  ;;  %s2536_s9 = smov (!%p2490_p9, %s1425_s9), [#allocation20] }
  0x72   : > { %p2491_p4 = pmov %p2490_p9  ;;  %s399_s27 = scalar_lea.vmem [#allocation13], %s1259_s1 }
  0x73   : > { %s2208_s18 = scalar_select %p199_p5, %s1852_s13, %s201_s30  }
  0x74   : > { %s2538_s2 = smov (!%p2491_p4, %s2534_s2), 0  ;;  %p2492_p1 = pmov %p2491_p4 }
  0x75   : > { %s407_s11 = sld [smem:[%s2536_s9 + %s2538_s2]]  ;;  %s415_s26 = sshll.u32 %s399_s27, 4  ;;  %s416_s26 = int_to_ptr.vmem [resolvable:$true] %s415_s26 }
  0x76   : > { %p2214_p6 = pnand %p2492_p1, %p210_p7  ;;  %s1717_s25 = scalar_lea.hbm %s2428_s6, 384 }
  0x78   : > { %p1714_p11 = pneg %p2214_p6 }
  0x7b   : > { %s1374_s24 = sshll.u32 %s407_s11, 6 }
  0x7c   : > { %s412_s22 = scalar_lea.hbm %s2428_s6, %s1374_s24 }
  0x7d   : > { %s413_s19 = sshll.u32 %s412_s22, 4  ;;  %s414_s19 = int_to_ptr.hbm [resolvable:$true] %s413_s19 }
  0x7e   : > { %s1710_s28 = sshra.s32 %s414_s19, 4  ;;  %s1711_s28 = int_to_ptr.hbm [resolvable:$true] %s1710_s28 }
  0x7f   : > { %s1712_s4 = scalar_lea.hbm %s1711_s28, 64  ;;  %p1718_p0 = scmp.lt.s32.totalorder %s1711_s28, %s2428_s6 }
  0x80   : > { %p1713_p10 = scmp.ne.s32.totalorder %s1711_s28, %s1712_s4  ;;  %p1719_p5 = scmp.lt.s32.totalorder %s1717_s25, %s1712_s4 }
  0x82   : > { %p1715_p13 = pnand %p1714_p11, %p1713_p10  ;;  %p1720_p9 = por %p1719_p5, %p1718_p0 }
  0x84   : > { %p1716_p7 = pneg %p1715_p13 }
  0x86   : > { %p1721_p4 = pnand %p1720_p9, %p1716_p7 }
  0x88   : > { %1724 = shalt.err (!%p1721_p4)
}
  0x89   : > { %1461 = dma.hbm_to_vmem [thread:$0]  (!%p2214_p6), %s414_s19, 1024, %s416_s26, %s2128_s16, %s2478_s10, %s2478_s10, %s2477_s14  }
  0x8a   : > { %449 = sbr.rel (%p2021_p3) target bundleno = 633 (0x279), region = 44  ;;  %p2495_p1 = scmp.eq.s32.totalorder (!%p2021_p3), %s2013_s21, 0 }
  0x8f   : > { %1819 = dma.done.wait (%p2495_p1), [#allocation7], 1024   ;;  %p2496_p10 = pmov %p2495_p1 }
  0x90   : > { %p2497_p11 = pmov %p2495_p1 }
  0x91   : > { %1821 = vsyncadd (%p2496_p10), [#allocation7], 4294966272 }
  0x92   : > { %1823 = dma.done.wait (%p2497_p11), [#allocation10], 2048   ;;  %p2498_p13 = pmov %p2495_p1 }
  0x93   : > { %s2499_s30 = sld [smem:[#allocation30_spill]]  ;;  %s461_s8 = sand.u32 1, %s2013_s21  }
  0x94   : > { %1825 = vsyncadd (%p2498_p13), [#allocation10], 4294965248  ;;  %s462_s10 = scalar_lea.sflag [#allocation7], %s461_s8 }
  0x99   : > { %s463_s16 = sand.u32 1, %s2499_s30  }
  0x9a   : > { %s1266_s14 = sshll.u32 %s463_s16, 6 }
  0x9b   : > { %s2247_s11 = scalar_lea.vmem [#allocation11], %s1266_s14 }
  0x9c   : > { %1827 = dma.done.wait (%p2067_p12), %s462_s10, 1024  }
  0x9d   : > { %1829 = vsyncadd (%p2067_p12), %s462_s10, 4294966272  ;;  %s2501_s27 = sld [smem:[#allocation28_spill]] }
  0xa3   : > { %s473_s24 = sand.u32 1, %s2501_s27  }
  0xa4   : > { %s2254_s0 = scalar_lea.vmem [#allocation12], %s473_s24 }
  0xa5   : > { %1831 = dma.done.wait (%p2115_p8), %s462_s10, 16  }
  0xa6   : > { %1833 = vsyncadd (%p2115_p8), %s462_s10, 4294967280  ;;  %s482_s15 = sand.u32 1, %s1848_s12  }
  0xa7   : > { %s1267_s22 = sshll.u32 %s482_s15, 6 }
  0xa8   : > { %s2261_s19 = scalar_lea.vmem [#allocation13], %s1267_s22 }
  0xa9   : > { %1835 = dma.done.wait (%p2198_p2), %s462_s10, 1024  }
  0xaa   : > { %1837 = vsyncadd (%p2198_p2), %s462_s10, 4294966272  ;;  %s2503_s28 = sld [smem:[#allocation32_spill]] }
  0xab   : > { %s2504_s30 = sld [smem:[#allocation43_spill]] }
  0xb0   : > { %s555_s4 = sshra.s32 %s2503_s28, 7  ;;  %s560_s7 = sand.u32 127, %s2503_s28 }
  0xb1   : > { %s1268_s2 = sshll.u32 %s555_s4, 7  ;;  %p1269_p12 = scmp.ne.s32.totalorder %s2503_s28, 0 }
  0xb2   : > { %s2269_s25 = sadd.s32 %s1268_s2, %s560_s7 }
  0xb3   : > { %s562_s17 = sld [smem:[#allocation4 + %s2269_s25]] }
  0xb8   : > { %578 = sbr.rel (%p1269_p12) target bundleno = 206 (0xce), region = 68 }
  0xb9   : > { %p563_p3 = scmp.lt.s32.totalorder %s562_s17, 5 }
  0xbb   : > { %s2540_s17 = smov (!%p563_p3, %s562_s17), 5 }
  0xbc   : > { %s565_s1 = scalar_lea.vmem %s2504_s30, %s2540_s17 }
  0xbd   : > { %v1897_v0 = vmov 0.0  }
  0xbe   : > { %579 = vst [vmem:[#allocation2 + $0x30] sm:$0xff] %v1897_v0 }
  0xbf   : > { %580 = vst [vmem:[#allocation2] sm:$0xff] %v1897_v0 }
  0xc0   : > { %581 = vst [vmem:[#allocation2 + $0x58] sm:$0xff] %v1897_v0 }
  0xc1   : > { %582 = vst [vmem:[#allocation2 + $0x18] sm:$0xff] %v1897_v0 }
  0xc2   : > { %583 = vst [vmem:[#allocation2 + $0x50] sm:$0xff] %v1897_v0 }
  0xc3   : > { %584 = vst [vmem:[#allocation2 + $0x68] sm:$0xff] %v1897_v0 }
  0xc4   : > { %585 = vst [vmem:[#allocation2 + $0x8] sm:$0xff] %v1897_v0 }
  0xc5   : > { %586 = vst [vmem:[#allocation2 + $0x48] sm:$0xff] %v1897_v0 }
  0xc6   : > { %587 = vst [vmem:[#allocation2 + $0x40] sm:$0xff] %v1897_v0 }
  0xc7   : > { %588 = vst [vmem:[#allocation2 + $0x20] sm:$0xff] %v1897_v0 }
  0xc8   : > { %589 = vst [vmem:[#allocation2 + $0x10] sm:$0xff] %v1897_v0 }
  0xc9   : > { %590 = vst [vmem:[#allocation2 + $0x38] sm:$0xff] %v1897_v0 }
  0xca   : > { %591 = vst [vmem:[#allocation2 + $0x60] sm:$0xff] %v1897_v0 }
  0xcb   : > { %592 = vst [vmem:[#allocation2 + $0x70] sm:$0xff] %v1897_v0 }
  0xcc   : > { %593 = vst [vmem:[#allocation2 + $0x78] sm:$0xff] %v1897_v0 }
  0xcd   : > { %594 = vst [vmem:[#allocation2 + $0x28] sm:$0xff] %v1897_v0 }
  0xce PF: > { %s595_s29 = sld [smem:[#allocation5]] }
  0xcf   : > { %s2505_s8 = sld [smem:[#allocation32_spill]] }
  0xd5   : > { %p1270_p8 = scmp.ge.s32.totalorder %s2505_s8, %s595_s29 }
  0xd6   : > { %s607_s16 = sld [smem:[#allocation4 + %s2269_s25]] (!%p1270_p8) }
  0xd7   : > { %599 = sbr.rel (%p1270_p8) target bundleno = 593 (0x251), region = 72 }
  0xdc   : > { %v1390_v1 = vld [vmem:[%s2247_s11 + $0x38] sm:$0xff]  ;;  %v1389_v2 = vld [vmem:[%s2247_s11 + $0x30] sm:$0xff]  ;;  %v1388_v3 = vld [vmem:[%s2247_s11 + $0x28] sm:$0xff]  ;;  %v930_v25 = vlaneseq  ;;  %v932_v27 = vstv %s607_s16 }
  0xdd   : > { %740 = vmatpush.bf16.msra.mxu0 %v1390_v1  ;;  %1399 = vmatpush.bf16.msra.mxu2 %v1390_v1  ;;  %v1387_v4 = vld [vmem:[%s2247_s11 + $0x20] sm:$0xff]  ;;  %v1386_v5 = vld [vmem:[%s2247_s11 + $0x18] sm:$0xff]  ;;  %v1385_v6 = vld [vmem:[%s2247_s11 + $0x10] sm:$0xff] }
  0xde   : > { %v1384_v7 = vld [vmem:[%s2247_s11 + $0x8] sm:$0xff]  ;;  %v1383_v8 = vld [vmem:[%s2247_s11] sm:$0xff]  ;;  %v1397_v14 = vld [vmem:[%s2261_s19 + $0x30] sm:$0xff]  ;;  %v931_v26 = vand.u32 127, %v930_v25 }
  0xdf   : > { %v1375_v9 = vld [vmem:[#allocation6] sm:$0xff]  ;;  %v1376_v11 = vld [vmem:[#allocation6 + $0x8] sm:$0xff]  ;;  %v1377_v17 = vld [vmem:[#allocation6 + $0x10] sm:$0xff] }
  0xe0   : > { %v1379_v10 = vld [vmem:[#allocation6 + $0x20] sm:$0xff]  ;;  %v1380_v12 = vld [vmem:[#allocation6 + $0x28] sm:$0xff]  ;;  %v1381_v18 = vld [vmem:[#allocation6 + $0x30] sm:$0xff]  ;;  %vm2297_vm0 = vcmp.eq.s32.totalorder %v931_v26, %v932_v27 }
  0xe1   : > { %741 = vmatpush.bf16.msra.mxu0 %v1389_v2  ;;  %1400 = vmatpush.bf16.msra.mxu2 %v1389_v2  ;;  %v1398_v13 = vld [vmem:[%s2261_s19 + $0x38] sm:$0xff]  ;;  %v1396_v15 = vld [vmem:[%s2261_s19 + $0x28] sm:$0xff]  ;;  %v1395_v16 = vld [vmem:[%s2261_s19 + $0x20] sm:$0xff] }
  0xe2   : > { %881 = vmatpush.bf16.msra.mxu1 %v1398_v13  ;;  %1407 = vmatpush.bf16.msra.mxu3 %v1398_v13  ;;  %v1378_v19 = vld [vmem:[#allocation6 + $0x18] sm:$0xff]  ;;  %v1392_v23 = vld [vmem:[%s2261_s19 + $0x8] sm:$0xff]  ;;  %v1391_v24 = vld [vmem:[%s2261_s19] sm:$0xff] }
  0xe3   : > { %v1382_v20 = vld [vmem:[#allocation6 + $0x38] sm:$0xff]  ;;  %v938_v29 = vld [vmem:[#allocation9 + $0x20] sm:$0xff]  ;;  %v939_v33 = vld [vmem:[#allocation9 + $0x28] sm:$0xff] }
  0xe4   : > { %v1394_v21 = vld [vmem:[%s2261_s19 + $0x18] sm:$0xff]  ;;  %v1393_v22 = vld [vmem:[%s2261_s19 + $0x10] sm:$0xff]  ;;  %v954_v31 = vsel %vm2297_vm0, %v938_v29, 0.0  ;;  %v935_v35 = vld [vmem:[#allocation9 + $0x8] sm:$0xff]  ;;  %v955_v36 = vsel %vm2297_vm0, %v939_v33, 0.0 }
  0xe5   : > { %742 = vmatpush.bf16.msra.mxu0 %v1388_v3  ;;  %1401 = vmatpush.bf16.msra.mxu2 %v1388_v3  ;;  %v934_v30 = vld [vmem:[#allocation9] sm:$0xff]  ;;  %v936_v34 = vld [vmem:[#allocation9 + $0x10] sm:$0xff]  ;;  %v951_v38 = vsel %vm2297_vm0, %v935_v35, 0.0  ;;  %v937_v43 = vld [vmem:[#allocation9 + $0x18] sm:$0xff] }
  0xe6   : > { %882 = vmatpush.bf16.msra.mxu1 %v1397_v14  ;;  %1408 = vmatpush.bf16.msra.mxu3 %v1397_v14  ;;  %v950_v32 = vsel %vm2297_vm0, %v934_v30, 0.0  ;;  %v952_v37 = vsel %vm2297_vm0, %v936_v34, 0.0  ;;  %v2312_v40 = vld [vmem:[%s2254_s0] ss:$0 sm:$0xff]  ;;  %v940_v44 = vld [vmem:[#allocation9 + $0x30] sm:$0xff]  ;;  %v953_v47 = vsel %vm2297_vm0, %v937_v43, 0.0 }
  0xe7   : > { %974 = vadd.xlane.f32.xlu2 %v954_v31  ;;  %966 = vadd.xlane.f32.xlu0 %v950_v32  ;;  %v942_v42 = vld [vmem:[#allocation9 + $0x40] sm:$0xff]  ;;  %v956_v48 = vsel %vm2297_vm0, %v940_v44, 0.0  ;;  %v941_v55 = vld [vmem:[#allocation9 + $0x38] sm:$0xff]  ;;  %v943_v56 = vld [vmem:[#allocation9 + $0x48] sm:$0xff] }
  0xe8   : > { %970 = vadd.xlane.f32.xlu1 %v952_v37  ;;  %v958_v46 = vsel %vm2297_vm0, %v942_v42, 0.0  ;;  %v957_v58 = vsel %vm2297_vm0, %v941_v55, 0.0  ;;  %v959_v59 = vsel %vm2297_vm0, %v943_v56, 0.0  ;;  %v944_v2 = vld [vmem:[#allocation9 + $0x50] sm:$0xff]  ;;  %v949_v31 = vld [vmem:[#allocation9 + $0x78] sm:$0xff] }
  0xe9   : > { %743 = vmatpush.bf16.msra.mxu0 %v1387_v4  ;;  %1402 = vmatpush.bf16.msra.mxu2 %v1387_v4  ;;  %v960_v4 = vsel %vm2297_vm0, %v944_v2, 0.0  ;;  %v965_v33 = vsel %vm2297_vm0, %v949_v31, 0.0 }
  0xea   : > { %883 = vmatpush.bf16.msra.mxu1 %v1396_v15  ;;  %1409 = vmatpush.bf16.msra.mxu3 %v1396_v15 }
  0xed   : > { %744 = vmatpush.bf16.msra.mxu0 %v1386_v5  ;;  %1403 = vmatpush.bf16.msra.mxu2 %v1386_v5 }
  0xee   : > { %884 = vmatpush.bf16.msra.mxu1 %v1395_v16  ;;  %1410 = vmatpush.bf16.msra.mxu3 %v1395_v16 }
  0xef   : > { %976 = vadd.xlane.f32.xlu2 %v955_v36  ;;  %968 = vadd.xlane.f32.xlu0 %v951_v38 }
  0xf0   : > { %972 = vadd.xlane.f32.xlu1 %v953_v47 }
  0xf1   : > { %745 = vmatpush.bf16.msra.mxu0 %v1385_v6  ;;  %1404 = vmatpush.bf16.msra.mxu2 %v1385_v6 }
  0xf2   : > { %885 = vmatpush.bf16.msra.mxu1 %v1394_v21  ;;  %1411 = vmatpush.bf16.msra.mxu3 %v1394_v21  ;;  %v947_v21 = vld [vmem:[#allocation9 + $0x68] sm:$0xff] }
  0xf3   : > { %v963_v25 = vsel %vm2297_vm0, %v947_v21, 0.0 }
  0xf5   : > { %746 = vmatpush.bf16.msra.mxu0 %v1384_v7  ;;  %1405 = vmatpush.bf16.msra.mxu2 %v1384_v7 }
  0xf6   : > { %886 = vmatpush.bf16.msra.mxu1 %v1393_v22  ;;  %1412 = vmatpush.bf16.msra.mxu3 %v1393_v22  ;;  %v948_v22 = vld [vmem:[#allocation9 + $0x70] sm:$0xff] }
  0xf7   : > { %982 = vadd.xlane.f32.xlu2 %v958_v46  ;;  %978 = vadd.xlane.f32.xlu0 %v956_v48  ;;  %v964_v26 = vsel %vm2297_vm0, %v948_v22, 0.0 }
  0xf8   : > { %980 = vadd.xlane.f32.xlu1 %v957_v58 }
  0xf9   : > { %747 = vmatpush.bf16.msra.mxu0 %v1383_v8  ;;  %1406 = vmatpush.bf16.msra.mxu2 %v1383_v8 }
  0xfa   : > { %887 = vmatpush.bf16.msra.mxu1 %v1392_v23  ;;  %1413 = vmatpush.bf16.msra.mxu3 %v1392_v23 }
  0xfc   : > { %748 = vmatmul.bf16.vlgmr.msra.gmra.mxu0 %v1375_v9  ;;  %768 = vmatmul.bf16.vlgmr.msra.gmra.mxu2 %v1379_v10 }
  0xfe   : > { %888 = vmatpush.bf16.msra.mxu1 %v1391_v24  ;;  %1414 = vmatpush.bf16.msra.mxu3 %v1391_v24 }
  0xff   : > { %984 = vadd.xlane.f32.xlu0 %v959_v59 }
 0x100   : > { %986 = vadd.xlane.f32.xlu1 %v960_v4  ;;  %v999_v4 = vld [vmem:[#allocation2] sm:$0xff] }
 0x108   : > { %992 = vadd.xlane.f32.xlu1 %v963_v25 }
 0x10c   : > { %753 = vmatmul.bf16.gmra.mxu0 %v1376_v11  ;;  %773 = vmatmul.bf16.gmra.mxu2 %v1380_v12  ;;  %v945_v11 = vld [vmem:[#allocation9 + $0x58] sm:$0xff] }
 0x10d   : > { %v961_v13 = vsel %vm2297_vm0, %v945_v11, 0.0  ;;  %v1006_v11 = vld [vmem:[#allocation2 + $0x40] sm:$0xff] }
 0x10e   : > { %988 = vadd.xlane.f32.xlu2 %v961_v13 }
 0x116   : > { %994 = vadd.xlane.f32.xlu2 %v964_v26 }
 0x11c   : > { %758 = vmatmul.bf16.gmra.mxu0 %v1377_v17  ;;  %778 = vmatmul.bf16.gmra.mxu2 %v1381_v18 }
 0x12c   : > { %763 = vmatmul.bf16.gmra.mxu0 %v1378_v19  ;;  %783 = vmatmul.bf16.gmra.mxu2 %v1382_v20  ;;  %v946_v20 = vld [vmem:[#allocation9 + $0x60] sm:$0xff] }
 0x12d   : > { %v962_v24 = vsel %vm2297_vm0, %v946_v20, 0.0 }
 0x12e   : > { %990 = vadd.xlane.f32.xlu0 %v962_v24 }
 0x136   : > { %996 = vadd.xlane.f32.xlu0 %v965_v33 }
 0x15a   : > { %v967_v55 = vpop.xlane.xlu0 %966  ;;  %v975_v56 = vpop.xlane.xlu2 %974 }
 0x15b   : > { %v971_v58 = vpop.xlane.xlu1 %970 }
 0x163   : > { %v973_v2 = vpop.xlane.xlu1 %972 }
 0x179   : > { %v749_v39 = vpop.f32.mrf.mxu0 }
 0x17a   : > { %v750_v41 = vadd.f32 %v2312_v40, %v749_v39 }
 0x17c   : > { %v789_v50 = vmax.f32 %v750_v41, 0.0 }
 0x17f   : > { %v769_v45 = vpop.f32.mrf.mxu2 }
 0x180   : > { %v770_v53 = vadd.f32 %v2312_v40, %v769_v45 }
 0x181   : > { %v751_v49 = vpop.f32.mrf.mxu0 }
 0x182   : > { %v752_v51 = vadd.f32 %v2312_v40, %v751_v49  ;;  %v797_v62 = vmax.f32 %v770_v53, 0.0 }
 0x184   : > { %v790_v52 = vmax.f32 %v752_v51, 0.0 }
 0x186   : > { %v805_v54 = vpack.c.bf16 %v790_v52, %v789_v50 }
 0x187   : > { %v771_v57 = vpop.f32.mrf.mxu2 }
 0x188   : > { %v772_v60 = vadd.f32 %v2312_v40, %v771_v57  ;;  %889 = vmatmul.bf16.vlgmr.msra.gmra.mxu1 %v805_v54  ;;  %v2357_v57 = vld [vmem:[%s565_s1] ss:$0 sm:$0xff] }
 0x189   : > { %v754_v61 = vpop.f32.mrf.mxu0 }
 0x18a   : > { %v798_v63 = vmax.f32 %v772_v60, 0.0  ;;  %v755_v1 = vadd.f32 %v2312_v40, %v754_v61  ;;  %v969_v60 = vpop.xlane.xlu0 %968 }
 0x18c   : > { %v809_v0 = vpack.c.bf16 %v798_v63, %v797_v62  ;;  %v791_v6 = vmax.f32 %v755_v1, 0.0  ;;  %v998_v62 = vld [vmem:[#allocation2 + $0x30] sm:$0xff] }
 0x18e   : > { %909 = vmatmul.bf16.vlgmr.msra.gmra.mxu3 %v809_v0 }
 0x18f   : > { %v774_v3 = vpop.f32.mrf.mxu2 }
 0x190   : > { %v775_v9 = vadd.f32 %v2312_v40, %v774_v3 }
 0x191   : > { %v756_v5 = vpop.f32.mrf.mxu0 }
 0x192   : > { %v757_v7 = vadd.f32 %v2312_v40, %v756_v5  ;;  %v799_v16 = vmax.f32 %v775_v9, 0.0  ;;  %v2361_v5 = vpop.xlane.xlu0 %978 }
 0x194   : > { %v792_v8 = vmax.f32 %v757_v7, 0.0 }
 0x196   : > { %v806_v10 = vpack.c.bf16 %v792_v8, %v791_v6 }
 0x197   : > { %v776_v12 = vpop.f32.mrf.mxu2 }
 0x198   : > { %v777_v14 = vadd.f32 %v2312_v40, %v776_v12  ;;  %894 = vmatmul.bf16.gmra.mxu1 %v806_v10 }
 0x199   : > { %v759_v15 = vpop.f32.mrf.mxu0 }
 0x19a   : > { %v800_v17 = vmax.f32 %v777_v14, 0.0  ;;  %v760_v19 = vadd.f32 %v2312_v40, %v759_v15  ;;  %v985_v20 = vpop.xlane.xlu0 %984 }
 0x19c   : > { %v810_v18 = vpack.c.bf16 %v800_v17, %v799_v16  ;;  %v793_v29 = vmax.f32 %v760_v19, 0.0  ;;  %v1000_v16 = vld [vmem:[#allocation2 + $0x58] sm:$0xff]  ;;  %v2365_v17 = vpop.xlane.xlu1 %980 }
 0x19e   : > { %914 = vmatmul.bf16.gmra.mxu3 %v810_v18 }
 0x19f   : > { %v779_v23 = vpop.f32.mrf.mxu2 }
 0x1a0   : > { %v780_v34 = vadd.f32 %v2312_v40, %v779_v23  ;;  %v1007_v23 = vld [vmem:[#allocation2 + $0x20] sm:$0xff] }
 0x1a1   : > { %v761_v27 = vpop.f32.mrf.mxu0 }
 0x1a2   : > { %v762_v30 = vadd.f32 %v2312_v40, %v761_v27  ;;  %v801_v39 = vmax.f32 %v780_v34, 0.0 }
 0x1a4   : > { %v794_v32 = vmax.f32 %v762_v30, 0.0 }
 0x1a6   : > { %v807_v35 = vpack.c.bf16 %v794_v32, %v793_v29  ;;  %v1001_v29 = vld [vmem:[#allocation2 + $0x18] sm:$0xff]  ;;  %v987_v32 = vpop.xlane.xlu1 %986 }
 0x1a7   : > { %v781_v36 = vpop.f32.mrf.mxu2 }
 0x1a8   : > { %v782_v37 = vadd.f32 %v2312_v40, %v781_v36  ;;  %899 = vmatmul.bf16.gmra.mxu1 %v807_v35  ;;  %v1008_v35 = vld [vmem:[#allocation2 + $0x10] sm:$0xff] }
 0x1a9   : > { %v764_v38 = vpop.f32.mrf.mxu0 }
 0x1aa   : > { %v802_v41 = vmax.f32 %v782_v37, 0.0  ;;  %v765_v43 = vadd.f32 %v2312_v40, %v764_v38 }
 0x1ac   : > { %v811_v42 = vpack.c.bf16 %v802_v41, %v801_v39  ;;  %v795_v28 = vmax.f32 %v765_v43, 0.0  ;;  %v1002_v41 = vld [vmem:[#allocation2 + $0x50] sm:$0xff] }
 0x1ae   : > { %919 = vmatmul.bf16.gmra.mxu3 %v811_v42 }
 0x1af   : > { %v784_v44 = vpop.f32.mrf.mxu2 }
 0x1b0   : > { %v785_v48 = vadd.f32 %v2312_v40, %v784_v44 }
 0x1b1   : > { %v766_v45 = vpop.f32.mrf.mxu0 }
 0x1b2   : > { %v767_v46 = vadd.f32 %v2312_v40, %v766_v45  ;;  %v803_v52 = vmax.f32 %v785_v48, 0.0 }
 0x1b4   : > { %v796_v47 = vmax.f32 %v767_v46, 0.0  ;;  %v1009_v46 = vld [vmem:[#allocation2 + $0x38] sm:$0xff] }
 0x1b6   : > { %v808_v49 = vpack.c.bf16 %v796_v47, %v795_v28 }
 0x1b7   : > { %v786_v50 = vpop.f32.mrf.mxu2 }
 0x1b8   : > { %v787_v51 = vadd.f32 %v2312_v40, %v786_v50  ;;  %904 = vmatmul.bf16.gmra.mxu1 %v808_v49  ;;  %v977_v40 = vpop.xlane.xlu2 %976 }
 0x1ba   : > { %v804_v53 = vmax.f32 %v787_v51, 0.0  ;;  %v1003_v51 = vld [vmem:[#allocation2 + $0x68] sm:$0xff] }
 0x1bc   : > { %v812_v54 = vpack.c.bf16 %v804_v53, %v803_v52 }
 0x1be   : > { %924 = vmatmul.bf16.gmra.mxu3 %v812_v54  ;;  %v991_v54 = vpop.xlane.xlu0 %990 }
 0x1c0   : > { %v983_v8 = vpop.xlane.xlu2 %982 }
 0x1c8   : > { %v989_v44 = vpop.xlane.xlu2 %988 }
 0x205   : > { %v890_v59 = vpop.f32.mrf.mxu1 }
 0x206   : > { %v891_v61 = vadd.f32 %v2357_v57, %v890_v59 }
 0x208   : > { %v1014_v63 = vmul.f32 %v967_v55, %v891_v61 }
 0x20a   : > { %v1030_v0 = vadd.f32 %v1014_v63, %v998_v62  ;;  %v1004_v63 = vld [vmem:[#allocation2 + $0x8] sm:$0xff] }
 0x20c   : > { %1046 = vst [vmem:[#allocation2 + $0x30] sm:$0xff] %v1030_v0 }
 0x20d   : > { %v892_v1 = vpop.f32.mrf.mxu1 }
 0x20e   : > { %v893_v3 = vadd.f32 %v2357_v57, %v892_v1 }
 0x210   : > { %v1015_v6 = vmul.f32 %v969_v60, %v893_v3 }
 0x211   : > { %v910_v7 = vpop.f32.mrf.mxu3 }
 0x212   : > { %v1031_v9 = vadd.f32 %v1015_v6, %v999_v4  ;;  %v911_v10 = vadd.f32 %v2357_v57, %v910_v7  ;;  %v1011_v4 = vld [vmem:[#allocation2 + $0x70] sm:$0xff] }
 0x214   : > { %1047 = vst [vmem:[#allocation2] sm:$0xff] %v1031_v9  ;;  %v1022_v12 = vmul.f32 %v983_v8, %v911_v10  ;;  %v1005_v10 = vld [vmem:[#allocation2 + $0x48] sm:$0xff] }
 0x215   : > { %v895_v13 = vpop.f32.mrf.mxu1 }
 0x216   : > { %v1038_v14 = vadd.f32 %v1022_v12, %v1006_v11  ;;  %v896_v15 = vadd.f32 %v2357_v57, %v895_v13  ;;  %v995_v13 = vpop.xlane.xlu2 %994 }
 0x218   : > { %1054 = vst [vmem:[#allocation2 + $0x40] sm:$0xff] %v1038_v14  ;;  %v1016_v18 = vmul.f32 %v971_v58, %v896_v15  ;;  %v1010_v58 = vld [vmem:[#allocation2 + $0x60] sm:$0xff]  ;;  %v1012_v15 = vld [vmem:[#allocation2 + $0x78] sm:$0xff] }
 0x219   : > { %v912_v19 = vpop.f32.mrf.mxu3 }
 0x21a   : > { %v1032_v21 = vadd.f32 %v1016_v18, %v1000_v16  ;;  %v913_v22 = vadd.f32 %v2357_v57, %v912_v19 }
 0x21c   : > { %1048 = vst [vmem:[#allocation2 + $0x58] sm:$0xff] %v1032_v21  ;;  %v1023_v24 = vmul.f32 %v985_v20, %v913_v22  ;;  %v997_v20 = vpop.xlane.xlu0 %996  ;;  %v1013_v22 = vld [vmem:[#allocation2 + $0x28] sm:$0xff] }
 0x21d   : > { %v897_v25 = vpop.f32.mrf.mxu1 }
 0x21e   : > { %v1039_v26 = vadd.f32 %v1023_v24, %v1007_v23  ;;  %v898_v27 = vadd.f32 %v2357_v57, %v897_v25 }
 0x220   : > { %1055 = vst [vmem:[#allocation2 + $0x20] sm:$0xff] %v1039_v26  ;;  %v1017_v30 = vmul.f32 %v973_v2, %v898_v27  ;;  %v993_v2 = vpop.xlane.xlu1 %992 }
 0x221   : > { %v915_v31 = vpop.f32.mrf.mxu3 }
 0x222   : > { %v1033_v33 = vadd.f32 %v1017_v30, %v1001_v29  ;;  %v916_v34 = vadd.f32 %v2357_v57, %v915_v31 }
 0x224   : > { %1049 = vst [vmem:[#allocation2 + $0x18] sm:$0xff] %v1033_v33  ;;  %v1024_v36 = vmul.f32 %v987_v32, %v916_v34 }
 0x225   : > { %v900_v37 = vpop.f32.mrf.mxu1 }
 0x226   : > { %v1040_v38 = vadd.f32 %v1024_v36, %v1008_v35  ;;  %v901_v39 = vadd.f32 %v2357_v57, %v900_v37 }
 0x228   : > { %1056 = vst [vmem:[#allocation2 + $0x10] sm:$0xff] %v1040_v38  ;;  %v1018_v42 = vmul.f32 %v975_v56, %v901_v39 }
 0x229   : > { %v917_v43 = vpop.f32.mrf.mxu3 }
 0x22a   : > { %v1034_v45 = vadd.f32 %v1018_v42, %v1002_v41  ;;  %v918_v28 = vadd.f32 %v2357_v57, %v917_v43 }
 0x22c   : > { %1050 = vst [vmem:[#allocation2 + $0x50] sm:$0xff] %v1034_v45  ;;  %v1025_v47 = vmul.f32 %v989_v44, %v918_v28 }
 0x22d   : > { %v902_v48 = vpop.f32.mrf.mxu1 }
 0x22e   : > { %v1041_v49 = vadd.f32 %v1025_v47, %v1009_v46  ;;  %v903_v50 = vadd.f32 %v2357_v57, %v902_v48 }
 0x230   : > { %1057 = vst [vmem:[#allocation2 + $0x38] sm:$0xff] %v1041_v49  ;;  %v1019_v52 = vmul.f32 %v977_v40, %v903_v50 }
 0x231   : > { %v920_v53 = vpop.f32.mrf.mxu3 }
 0x232   : > { %v1035_v55 = vadd.f32 %v1019_v52, %v1003_v51  ;;  %v921_v56 = vadd.f32 %v2357_v57, %v920_v53 }
 0x234   : > { %1051 = vst [vmem:[#allocation2 + $0x68] sm:$0xff] %v1035_v55  ;;  %v1026_v59 = vmul.f32 %v991_v54, %v921_v56 }
 0x235   : > { %v905_v60 = vpop.f32.mrf.mxu1 }
 0x236   : > { %v1042_v61 = vadd.f32 %v1026_v59, %v1010_v58  ;;  %v906_v62 = vadd.f32 %v2357_v57, %v905_v60 }
 0x238   : > { %1058 = vst [vmem:[#allocation2 + $0x60] sm:$0xff] %v1042_v61  ;;  %v1020_v0 = vmul.f32 %v2361_v5, %v906_v62 }
 0x239   : > { %v922_v1 = vpop.f32.mrf.mxu3 }
 0x23a   : > { %v1036_v3 = vadd.f32 %v1020_v0, %v1004_v63  ;;  %v923_v40 = vadd.f32 %v2357_v57, %v922_v1 }
 0x23c   : > { %1052 = vst [vmem:[#allocation2 + $0x8] sm:$0xff] %v1036_v3  ;;  %v1027_v6 = vmul.f32 %v993_v2, %v923_v40 }
 0x23d   : > { %v907_v7 = vpop.f32.mrf.mxu1 }
 0x23e   : > { %v1043_v8 = vadd.f32 %v1027_v6, %v1011_v4  ;;  %v908_v9 = vadd.f32 %v2357_v57, %v907_v7 }
 0x240   : > { %1059 = vst [vmem:[#allocation2 + $0x70] sm:$0xff] %v1043_v8  ;;  %v1021_v11 = vmul.f32 %v2365_v17, %v908_v9 }
 0x241   : > { %v925_v12 = vpop.f32.mrf.mxu3 }
 0x242   : > { %v1037_v14 = vadd.f32 %v1021_v11, %v1005_v10  ;;  %v926_v5 = vadd.f32 %v2357_v57, %v925_v12 }
 0x244   : > { %1053 = vst [vmem:[#allocation2 + $0x48] sm:$0xff] %v1037_v14  ;;  %v1028_v16 = vmul.f32 %v995_v13, %v926_v5 }
 0x246   : > { %v1044_v18 = vadd.f32 %v1028_v16, %v1012_v15 }
 0x248   : > { %1060 = vst [vmem:[#allocation2 + $0x78] sm:$0xff] %v1044_v18 }
 0x249   : > { %v927_v19 = vpop.f32.mrf.mxu3 }
 0x24a   : > { %v928_v21 = vadd.f32 %v2357_v57, %v927_v19 }
 0x24c   : > { %v1029_v23 = vmul.f32 %v997_v20, %v928_v21 }
 0x24e   : > { %v1045_v24 = vadd.f32 %v1029_v23, %v1013_v22 }
 0x250   : > { %1061 = vst [vmem:[#allocation2 + $0x28] sm:$0xff] %v1045_v24 }
 0x251 PF: > { %s2509_s27 = sld [smem:[#allocation32_spill]] }
 0x257   : > { %p1368_p2 = scmp.ne.s32.totalorder %s2509_s27, 5 }
 0x259   : > { %1065 = sbr.rel (%p1368_p2) target bundleno = 623 (0x26f), region = 76 }
 0x25e   : > { %v1066_v17 = vld [vmem:[#allocation2 + $0x30] sm:$0xff]  ;;  %v1067_v25 = vld [vmem:[#allocation2] sm:$0xff]  ;;  %v1068_v26 = vld [vmem:[#allocation2 + $0x58] sm:$0xff] }
 0x25f   : > { %1082 = vst [vmem:[#allocation14] sm:$0xff] %v1066_v17  ;;  %v1069_v27 = vld [vmem:[#allocation2 + $0x18] sm:$0xff]  ;;  %v1070_v29 = vld [vmem:[#allocation2 + $0x50] sm:$0xff]  ;;  %v1071_v30 = vld [vmem:[#allocation2 + $0x68] sm:$0xff] }
 0x260   : > { %1083 = vst [vmem:[#allocation14 + $0x8] sm:$0xff] %v1067_v25  ;;  %v1072_v31 = vld [vmem:[#allocation2 + $0x8] sm:$0xff]  ;;  %v1074_v32 = vld [vmem:[#allocation2 + $0x40] sm:$0xff]  ;;  %v1076_v34 = vld [vmem:[#allocation2 + $0x10] sm:$0xff] }
 0x261   : > { %1084 = vst [vmem:[#allocation14 + $0x10] sm:$0xff] %v1068_v26  ;;  %v1073_v57 = vld [vmem:[#allocation2 + $0x48] sm:$0xff]  ;;  %v1075_v33 = vld [vmem:[#allocation2 + $0x20] sm:$0xff]  ;;  %v1077_v35 = vld [vmem:[#allocation2 + $0x38] sm:$0xff] }
 0x262   : > { %1085 = vst [vmem:[#allocation14 + $0x18] sm:$0xff] %v1069_v27  ;;  %v1078_v36 = vld [vmem:[#allocation2 + $0x60] sm:$0xff]  ;;  %v1079_v37 = vld [vmem:[#allocation2 + $0x70] sm:$0xff]  ;;  %v1080_v38 = vld [vmem:[#allocation2 + $0x78] sm:$0xff] }
 0x263   : > { %1086 = vst [vmem:[#allocation14 + $0x20] sm:$0xff] %v1070_v29  ;;  %v1081_v39 = vld [vmem:[#allocation2 + $0x28] sm:$0xff] }
 0x264   : > { %1087 = vst [vmem:[#allocation14 + $0x28] sm:$0xff] %v1071_v30 }
 0x265   : > { %1088 = vst [vmem:[#allocation14 + $0x30] sm:$0xff] %v1072_v31 }
 0x266   : > { %1089 = vst [vmem:[#allocation14 + $0x38] sm:$0xff] %v1073_v57 }
 0x267   : > { %1090 = vst [vmem:[#allocation14 + $0x40] sm:$0xff] %v1074_v32 }
 0x268   : > { %1091 = vst [vmem:[#allocation14 + $0x48] sm:$0xff] %v1075_v33 }
 0x269   : > { %1092 = vst [vmem:[#allocation14 + $0x50] sm:$0xff] %v1076_v34 }
 0x26a   : > { %1093 = vst [vmem:[#allocation14 + $0x58] sm:$0xff] %v1077_v35 }
 0x26b   : > { %1094 = vst [vmem:[#allocation14 + $0x60] sm:$0xff] %v1078_v36 }
 0x26c   : > { %1095 = vst [vmem:[#allocation14 + $0x68] sm:$0xff] %v1079_v37 }
 0x26d   : > { %1096 = vst [vmem:[#allocation14 + $0x70] sm:$0xff] %v1080_v38 }
 0x26e   : > { %1097 = vst [vmem:[#allocation14 + $0x78] sm:$0xff] %v1081_v39 }
 0x26f PF: > { %p1467_p6 = scmp.eq.s32.totalorder %s2013_s21, 5  ;;  %s2510_s0 = sld [smem:[#allocation44_spill]] }
 0x270   : > { %s1898_s22 = smov [#allocation14]   ;;  %s1899_s28 = smov 128  }
 0x271   : > { %s1106_s19 = sshll.u32 %s1898_s22, 4  ;;  %s1900_s4 = smov 8   ;;  %s1107_s19 = int_to_ptr.vmem [resolvable:$true] %s1106_s19 }
 0x275   : > { %s1108_s15 = sshll.u32 %s2510_s0, 4  ;;  %s1109_s15 = int_to_ptr.hbm [resolvable:$true] %s1108_s15 }
 0x276   : > { %1436 = dma.vmem_to_hbm [thread:$0]  (%p1467_p6), %s1107_s19, 2048, %s1109_s15, [#allocation8], %s1899_s28, %s1899_s28, %s1900_s4  }
 0x277   : > { %1839 = dma.done.wait (%p1467_p6), [#allocation8], 2048  }
 0x278   : > { %1841 = vsyncadd (%p1467_p6), [#allocation8], 4294965248 }
 0x279 PF: > { %s30_s20 = sadd.s32 1, %s1888_s20   ;;  %s2511_s0 = sld [smem:[#allocation28_spill]] }
 0x27a   : > { %p27_p7 = scmp.ge.s32.totalorder %s30_s20, 8   ;;  %s2512_s14 = sld [smem:[#allocation29_spill]] }
 0x27b   : > { %s2513_s1 = sld [smem:[#allocation40_spill]]  ;;  %s2519_s11 = smov %s1848_s12 }
 0x27c   : > { %s2514_s15 = sld [smem:[#allocation30_spill]]  ;;  %s2520_s12 = smov %s1852_s13 }
 0x27d   : > { %s2515_s16 = sld [smem:[#allocation31_spill]]  ;;  %s2521_s13 = smov %s2208_s18 }
 0x27e   : > { %s2516_s17 = sld [smem:[#allocation38_spill]] }
 0x27f   : > { %s2517_s21 = sld [smem:[#allocation33_spill]] }
 0x280   : > { %s2518_s19 = sld [smem:[#allocation35_spill]] }
 0x281   :  { %29 = sbr.rel (!%p27_p7) target bundleno = 18 (0x12), region = 128 }
 0x285   : > { %s2522_s18 = smov %s2517_s21 }
 0x286   :  { %1125 = vsyncpa [#allocation7], 1 }
 0x287   :  { %1127 = vsyncpa [#allocation7 + $0x1], 1 }
 0x288   :  { %1128 = vsyncpa [#allocation10], 1 }
 0x289   :  { %1129 = vsyncpa [#allocation8], 1 }
 0x28a   :  { %1131 = vsyncpa [#allocation8 + $0x1], 1 }

</bundles_post_ra>
